<compile_context>
chip_gen: v7x
topology: tpu7x:2x2x1
jax: 0.10.0
libtpu: 0.0.40
codegen_flags: <defaults>
</compile_context>

<pallas_src>
import functools

import jax
import jax.numpy as jnp
from jax.experimental import pallas as pl
from jax.experimental.pallas import tpu as pltpu


_LANES = 128
_PER_BUFFER_BYTES = 8 << 20        # ~8 MiB per pipeline buffer (16 MiB double-buffered x)
_VMEM_LIMIT_BYTES = 32 << 20       # explicit scoped-VMEM limit; safe on v5e/v6e/v7x


# ---------------------------------------------------------------------------
# Kernels
# ---------------------------------------------------------------------------

def _matvec_rows_kernel(x_ref, w_ref, b_ref, o_ref):
    """General path.

    x_ref: (TB, D) input tile (native dtype, VMEM)
    w_ref: (1, D)  weight row (VMEM; constant index map -> resident)
    b_ref: (1,)    bias scalar (SMEM)
    o_ref: (1, TB) lane-dense output slab for this tile
    """
    prod = x_ref[...] * w_ref[...]                      # VPU multiply, native dtype
    acc = jnp.sum(prod, axis=-1, dtype=jnp.float32)     # (TB,) f32 lane reduction
    o_ref[...] = (acc + b_ref[0]).astype(o_ref.dtype)[None, :]   # full-width store


def _matvec_packed_kernel(xp_ref, wmat_ref, b_ref, o_ref):
    """Lane-packed path (128 % D == 0).

    xp_ref:   (TP, 128) packed input tile: each 128-lane row holds R = 128//D batch rows
    wmat_ref: (128, R)  block-diagonal weight (resident)
    b_ref:    (1,)      bias scalar (SMEM)
    o_ref:    (TP, R)   per-packed-row outputs (row-major == batch order)
    """
    acc = jnp.dot(xp_ref[...], wmat_ref[...], preferred_element_type=jnp.float32)
    o_ref[...] = (acc + b_ref[0]).astype(o_ref.dtype)


# ---------------------------------------------------------------------------
# Tiling helpers
# ---------------------------------------------------------------------------

def _round_up(x, m):
    return ((x + m - 1) // m) * m


def _pick_rows(total_rows, row_bytes, requested_rows, multiple):
    """Rows per tile: a multiple of `multiple` that fits the per-buffer budget.

    If no explicit request is given, the tile fills the VMEM budget but is capped at
    ~half the rows (so v7x's two TensorCores both get a grid step when possible).
    """
    if requested_rows is not None:
        tr = max(multiple, (requested_rows // multiple) * multiple)
    else:
        tr = max(multiple, (_PER_BUFFER_BYTES // row_bytes) // multiple * multiple)
        if total_rows >= 2 * multiple:
            half = _round_up(-(-total_rows // 2), multiple)
            tr = min(tr, half)
    tr = min(tr, _round_up(total_rows, multiple))
    return int(tr)


def _cost_estimate(x, w_like, bias, out_elems):
    xi = jnp.dtype(x.dtype).itemsize
    return pl.CostEstimate(
        flops=2 * x.shape[0] * x.shape[1],
        transcendentals=0,
        bytes_accessed=(x.size * xi
                        + w_like.size * jnp.dtype(w_like.dtype).itemsize
                        + bias.size * jnp.dtype(bias.dtype).itemsize
                        + out_elems * xi),
    )


# ---------------------------------------------------------------------------
# Wrapper (forward pass of the PyTorch Model)
# ---------------------------------------------------------------------------

def linear_forward(x, weight, bias, *, block_batch=None, xla_fallback_bytes=1 << 20):
    """y = x @ weight.T + bias  (nn.Linear(D, 1) forward).

    x:      (B, D)  input, kept in its native dtype (f32 accumulation in-kernel)
    weight: (1, D)  nn.Linear weight layout
    bias:   (1,)    nn.Linear bias
    returns (B, 1) in x.dtype.
    """
    B, D = x.shape
    assert weight.shape == (1, D) and bias.shape == (1,)
    itemsize = jnp.dtype(x.dtype).itemsize
    bias_smem = bias.reshape(1)

    # Tiny inputs: XLA fusion is strictly faster than a pallas_call launch.
    if B * D * itemsize < xla_fallback_bytes:
        return (jnp.dot(x, weight.T) + bias).astype(x.dtype)

    compiler_params = pltpu.CompilerParams(
        dimension_semantics=("parallel",),       # batch tiles are independent
        vmem_limit_bytes=_VMEM_LIMIT_BYTES,
    )

    # ---- Lane-packed path: small D that divides 128, batch divisible by R ----
    if D <= 64 and _LANES % D == 0 and B % (_LANES // D) == 0:
        R = _LANES // D
        P = B // R
        xp = x.reshape(P, _LANES)                               # free row-major view
        # (128, R) block-diagonal weight: column r carries `weight` in rows r*D..(r+1)*D-1
        wmat = jnp.kron(jnp.eye(R, dtype=weight.dtype), weight.reshape(D, 1)).astype(x.dtype)

        req = None if block_batch is None else max(8, block_batch // R)
        TP = _pick_rows(P, _LANES * itemsize, req, 8)
        grid = (pl.cdiv(P, TP),)

        out = pl.pallas_call(
            _matvec_packed_kernel,
            out_shape=jax.ShapeDtypeStruct((P, R), x.dtype),
            grid_spec=pltpu.PrefetchScalarGridSpec(
                num_scalar_prefetch=0,
                grid=grid,
                in_specs=[
                    pl.BlockSpec((TP, _LANES), lambda i: (i, 0)),           # packed x tile
                    pl.BlockSpec((_LANES, R), lambda i: (0, 0)),            # resident weight
                    pl.BlockSpec(memory_space=pltpu.MemorySpace.SMEM),      # bias scalar
                ],
                out_specs=pl.BlockSpec((TP, R), lambda i: (i, 0)),
            ),
            compiler_params=compiler_params,
            cost_estimate=_cost_estimate(x, wmat, bias, B),
        )(xp, wmat, bias_smem)
        return out.reshape(B, 1)

    # ---- General path: (TB, D) tiles, VPU reduce, lane-dense (1, TB) stores ----
    d_pad_bytes = _round_up(D, _LANES) * itemsize               # VMEM rows are lane-padded
    if _LANES * d_pad_bytes > _PER_BUFFER_BYTES:
        # TODO(synk): D-tiled reduction-grid path for very large D; fall back to XLA.
        return (jnp.dot(x, weight.T) + bias).astype(x.dtype)

    TB = _pick_rows(B, d_pad_bytes, block_batch, _LANES)
    n_tiles = pl.cdiv(B, TB)

    out = pl.pallas_call(
        _matvec_rows_kernel,
        out_shape=jax.ShapeDtypeStruct((1, n_tiles * TB), x.dtype),
        grid_spec=pltpu.PrefetchScalarGridSpec(
            num_scalar_prefetch=0,
            grid=(n_tiles,),
            in_specs=[
                pl.BlockSpec((TB, D), lambda i: (i, 0)),                # x tile (pipelined)
                pl.BlockSpec((1, D), lambda i: (0, 0)),                 # resident weight
                pl.BlockSpec(memory_space=pltpu.MemorySpace.SMEM),      # bias scalar
            ],
            out_specs=pl.BlockSpec((1, TB), lambda i: (0, i)),          # lane-dense slab
        ),
        compiler_params=compiler_params,
        cost_estimate=_cost_estimate(x, weight, bias, B),
    )(x, weight, bias_smem)

    return out[0, :B].reshape(B, 1)                              # drop padded tail lanes


# ---------------------------------------------------------------------------
# Self-test
# ---------------------------------------------------------------------------

if __name__ == "__main__":
    root = jax.random.PRNGKey(0)

    def make_inputs(k, batch, d, dtype=jnp.float32):
        kx, kw, kb = jax.random.split(k, 3)
        x = jax.random.normal(kx, (batch, d), dtype=dtype)
        bound = 1.0 / (d ** 0.5)
        w = jax.random.uniform(kw, (1, d), minval=-bound, maxval=bound, dtype=dtype)
        b = jax.random.uniform(kb, (1,), minval=-bound, maxval=bound, dtype=dtype)
        return x, w, b

    def check(x, w, b, **kwargs):
        fwd = jax.jit(functools.partial(linear_forward, **kwargs))
        y = fwd(x, w, b)
        jax.block_until_ready(y)
        y_ref = x.astype(jnp.float32) @ w.astype(jnp.float32).T + b.astype(jnp.float32)
        assert y.shape == (x.shape[0], 1)
        assert jnp.allclose(y.astype(jnp.float32), y_ref, atol=1e-5, rtol=1e-5), \
            "mismatch vs reference"

    k1, k2, k3 = jax.random.split(root, 3)

    # 1) Lane-packed Pallas path: D=32 (4 batch rows per 128-lane row), 2-step grid.
    x, w, b = make_inputs(k1, 512, 32)
    check(x, w, b, block_batch=256, xla_fallback_bytes=0)

    # 2) General Pallas path: D=48 (does not divide 128), partial last batch tile.
    x, w, b = make_inputs(k2, 272, 48)
    check(x, w, b, block_batch=128, xla_fallback_bytes=0)

    # 3) Tiny-input fallback path (default thresholds -> plain XLA).
    x, w, b = make_inputs(k3, 8, 32)
    check(x, w, b)

    print("KERNEL_OK")
</pallas_src>

<mosaic_0001>
module attributes {stable_mosaic.version = 11 : i64} {
  func.func @_matvec_packed_kernel(%arg0: i32, %arg1: memref<64x128xf32, #tpu.memory_space<vmem>>, %arg2: memref<128x4xf32, #tpu.memory_space<vmem>>, %arg3: memref<1xf32, #tpu.memory_space<smem>>, %arg4: memref<64x4xf32, #tpu.memory_space<vmem>>) attributes {dimension_semantics = [#tpu.dimension_semantics<parallel>], iteration_bounds = array<i64: 2>, scalar_prefetch = 0 : i64, scratch_operands = 0 : i64, tpu.core_type = #tpu.core_type<tc>, window_params = [{transform_indices = @transform_0, window_bounds = array<i64: 64, 128>}, {pipeline_mode = #tpu.pipeline_mode<synchronous>, transform_indices = @transform_1, window_bounds = array<i64: 128, 4>}, {transform_indices = @transform_2, window_bounds = array<i64: 1>}, {transform_indices = @transform_3, window_bounds = array<i64: 64, 4>}]} {
    %c0 = arith.constant 0 : index
    %c0_0 = arith.constant 0 : index
    %0 = vector.load %arg1[%c0, %c0_0] : memref<64x128xf32, #tpu.memory_space<vmem>>, vector<64x128xf32>
    %c0_1 = arith.constant 0 : index
    %c0_2 = arith.constant 0 : index
    %1 = vector.load %arg2[%c0_1, %c0_2] : memref<128x4xf32, #tpu.memory_space<vmem>>, vector<128x4xf32>
    %cst = arith.constant dense<0.000000e+00> : vector<64x4xf32>
    %2 = tpu.matmul %0, %1, %cst {dimension_numbers = #tpu.dot_dimension_numbers<[1], [0], [0], [1], [0, 0, 1, 1], [], []>} : vector<64x128xf32>, vector<128x4xf32>, vector<64x4xf32> -> vector<64x4xf32>
    %c0_3 = arith.constant 0 : index
    %3 = memref.load %arg3[%c0_3] : memref<1xf32, #tpu.memory_space<smem>>
    %4 = vector.broadcast %3 : f32 to vector<64x4xf32>
    %5 = arith.addf %2, %4 : vector<64x4xf32>
    %c0_4 = arith.constant 0 : index
    %c0_5 = arith.constant 0 : index
    %6 = vector.load %arg4[%c0_4, %c0_5] : memref<64x4xf32, #tpu.memory_space<vmem>>, vector<64x4xf32>
    tpu.vector_store %arg4[%c0_4, %c0_5], %5 {strides = array<i32>} : memref<64x4xf32, #tpu.memory_space<vmem>>, vector<64x4xf32>,
    return
  }
  func.func @transform_0(%arg0: i32) -> (i32, i32) {
    %c0_i32 = arith.constant 0 : i32
    %c0_i32_0 = arith.constant 0 : i32
    return %arg0, %c0_i32 : i32, i32
  }
  func.func @transform_1(%arg0: i32) -> (i32, i32) {
    %c0_i32 = arith.constant 0 : i32
    %c0_i32_0 = arith.constant 0 : i32
    %c0_i32_1 = arith.constant 0 : i32
    return %c0_i32, %c0_i32_0 : i32, i32
  }
  func.func @transform_2(%arg0: i32) -> i32 {
    %c0_i32 = arith.constant 0 : i32
    %c0_i32_0 = arith.constant 0 : i32
    return %c0_i32 : i32
  }
  func.func @transform_3(%arg0: i32) -> (i32, i32) {
    %c0_i32 = arith.constant 0 : i32
    %c0_i32_0 = arith.constant 0 : i32
    return %arg0, %c0_i32 : i32, i32
  }
}

</mosaic_0001>

<bundles_post_ra>
// kernel: linear_forward.1
= control target key start
LH: loop header
LB: loop body
LE: loop exit
PB: predicated region body
PF: predicated region fallthrough
CT: control target
= control target key end

     0   :  { %s537_s14 = smov 0   ;;  %s627_s0 = inlined_call_operand.vmem [shape: f32[128,128], index: 0, kind: input, shape index: {}]   ;;  %s628_s1 = inlined_call_operand.vmem [shape: f32[128,4], index: 1, kind: input, shape index: {}]   ;;  %s629_s2 = inlined_call_operand.<no memory space> [shape: f32[1], index: 2, kind: input, shape index: {}]   ;;  %s630_s3 = inlined_call_operand.vmem [shape: f32[128,4], index: 3, kind: output, shape index: {}]  }
   0x1   :  { %8 = sst [smem:[#allocation2]] %s629_s2 }
   0x2 LB: > { %s371_s15 = sadd.s32 4294967295, %s512_s14   ;;  %p375_p0 = scmp.ge.s32.totalorder %s512_s14, 1  ;;  %s512_s14 = sphi %s537_s14, %s14_s14  }
   0x3   : > { %p139_p1 = scmp.lt.s32.totalorder %s512_s14, 3 }
   0x5   : > { %p140_p2 = pnand %p375_p0, %p139_p1 }
   0x6   : > { %v183_v0 = vld [vmem:[%s628_s1] sm:$0xff] (!%p140_p2)  ;;  %v184_v1 = vld [vmem:[%s628_s1 + $0x8] sm:$0xff] (!%p140_p2)  ;;  %v185_v2 = vld [vmem:[%s628_s1 + $0x10] sm:$0xff] (!%p140_p2)  ;;  %s376_s21 = sshll.u32 (!%p140_p2), %s371_s15, 3  ;;  %s199_s26 = sld [smem:[#allocation2]] (!%p140_p2)  ;;  %vm306_vm0 = vcmask (!%p140_p2), 31744  }
   0x7   : > { %143 = sbr.rel (%p140_p2) target bundleno = 262 (0x106), region = 32  ;;  %v450_v3 = vpack.c.bf16 (!%p140_p2), %v184_v1, %v183_v0  ;;  %v186_v4 = vld [vmem:[%s628_s1 + $0x18] sm:$0xff] (!%p140_p2)  ;;  %p164_p3 = scmp.lt.s32.totalorder (!%p140_p2), %s376_s21, 15  ;;  %v187_v6 = vld [vmem:[%s628_s1 + $0x20] sm:$0xff] (!%p140_p2)  ;;  %v188_v7 = vld [vmem:[%s628_s1 + $0x28] sm:$0xff] (!%p140_p2) }
   0x8   : > { %v454_v5 = vpack.c.bf16 (!%p140_p2), %v186_v4, %v185_v2  ;;  %v458_v8 = vpack.c.bf16 (!%p140_p2), %v188_v7, %v187_v6  ;;  %v189_v9 = vld [vmem:[%s628_s1 + $0x30] sm:$0xff] (!%p140_p2)  ;;  %v190_v10 = vld [vmem:[%s628_s1 + $0x38] sm:$0xff] (!%p140_p2)  ;;  %v191_v14 = vld [vmem:[%s628_s1 + $0x40] sm:$0xff] (!%p140_p2) }
   0x9   : > { %451 = vmatprep.subr.bf16.mxu0 (!%p140_p2), %v450_v3  ;;  %482 = vmatprep.subr.bf16.mxu1 (!%p140_p2), %v450_v3  ;;  %v462_v13 = vpack.c.bf16 (!%p140_p2), %v190_v10, %v189_v9  ;;  %v192_v15 = vld [vmem:[%s628_s1 + $0x48] sm:$0xff] (!%p140_p2)  ;;  %v193_v17 = vld [vmem:[%s628_s1 + $0x50] sm:$0xff] (!%p140_p2)  ;;  %v194_v18 = vld [vmem:[%s628_s1 + $0x58] sm:$0xff] (!%p140_p2) }
   0xa   : > { %453 = vmatpush3.bf16.msra.mxu0 (!%p140_p2), %v450_v3  ;;  %490 = vmatpush3.bf16.msra.mxu1 (!%p140_p2), %v450_v3  ;;  %v466_v16 = vpack.c.bf16 (!%p140_p2), %v192_v15, %v191_v14  ;;  %v470_v19 = vpack.c.bf16 (!%p140_p2), %v194_v18, %v193_v17  ;;  %v195_v20 = vld [vmem:[%s628_s1 + $0x60] sm:$0xff] (!%p140_p2)  ;;  %v196_v21 = vld [vmem:[%s628_s1 + $0x68] sm:$0xff] (!%p140_p2)  ;;  %v197_v23 = vld [vmem:[%s628_s1 + $0x70] sm:$0xff] (!%p140_p2) }
   0xb   : > { %455 = vmatprep.subr.bf16.mxu0 (!%p140_p2), %v454_v5  ;;  %483 = vmatprep.subr.bf16.mxu1 (!%p140_p2), %v454_v5  ;;  %v474_v22 = vpack.c.bf16 (!%p140_p2), %v196_v21, %v195_v20  ;;  %v198_v24 = vld [vmem:[%s628_s1 + $0x78] sm:$0xff] (!%p140_p2) }
   0xc   : > { %v478_v25 = vpack.c.bf16 (!%p140_p2), %v198_v24, %v197_v23  ;;  %v200_v32 = vstv (!%p140_p2), %s199_s26 }
   0xe   : > { %s632_s21 = smov (!%p164_p3, %s376_s21), 15  ;;  %457 = vmatpush3.bf16.msra.mxu0 %v454_v5  ;;  %491 = vmatpush3.bf16.msra.mxu1 %v454_v5 }
   0xf   : > { %s377_s28 = sshll.u32 %s632_s21, 3  ;;  %459 = vmatprep.subr.bf16.mxu0 %v458_v8  ;;  %484 = vmatprep.subr.bf16.mxu1 %v458_v8 }
  0x10   : > { %s577_s8 = scalar_lea.vmem %s627_s0, %s377_s28  ;;  %s173_s30 = scalar_lea.vmem %s630_s3, %s377_s28 }
  0x11   : > { %v175_v11 = vld [vmem:[%s577_s8] sm:$0xff]  ;;  %v176_v26 = vld [vmem:[%s577_s8 + $0x8] sm:$0xff]  ;;  %v177_v28 = vld [vmem:[%s577_s8 + $0x10] sm:$0xff] }
  0x12   : > { %v179_v12 = vld [vmem:[%s577_s8 + $0x20] sm:$0xff]  ;;  %438 = vmatprep.mubr.f32.mxu0 %v175_v11  ;;  %461 = vmatpush3.bf16.msra.mxu0 %v458_v8  ;;  %v180_v27 = vld [vmem:[%s577_s8 + $0x28] sm:$0xff]  ;;  %v181_v29 = vld [vmem:[%s577_s8 + $0x30] sm:$0xff] }
  0x13   : > { %444 = vmatprep.mubr.f32.mxu1 %v179_v12  ;;  %492 = vmatpush3.bf16.msra.mxu1 %v458_v8  ;;  %v178_v30 = vld [vmem:[%s577_s8 + $0x18] sm:$0xff] }
  0x14   : > { %463 = vmatprep.subr.bf16.mxu0 %v462_v13  ;;  %485 = vmatprep.subr.bf16.mxu1 %v462_v13  ;;  %v182_v31 = vld [vmem:[%s577_s8 + $0x38] sm:$0xff] }
  0x16   : > { %465 = vmatpush3.bf16.msra.mxu0 %v462_v13 }
  0x17   : > { %493 = vmatpush3.bf16.msra.mxu1 %v462_v13  ;;  %467 = vmatprep.subr.bf16.mxu0 %v466_v16 }
  0x18   : > { %486 = vmatprep.subr.bf16.mxu1 %v466_v16 }
  0x1a   : > { %469 = vmatpush3.bf16.msra.mxu0 %v466_v16 }
  0x1b   : > { %494 = vmatpush3.bf16.msra.mxu1 %v466_v16  ;;  %471 = vmatprep.subr.bf16.mxu0 %v470_v19 }
  0x1c   : > { %487 = vmatprep.subr.bf16.mxu1 %v470_v19 }
  0x1e   : > { %473 = vmatpush3.bf16.msra.mxu0 %v470_v19 }
  0x1f   : > { %495 = vmatpush3.bf16.msra.mxu1 %v470_v19  ;;  %475 = vmatprep.subr.bf16.mxu0 %v474_v22 }
  0x20   : > { %488 = vmatprep.subr.bf16.mxu1 %v474_v22 }
  0x22   : > { %477 = vmatpush3.bf16.msra.mxu0 %v474_v22 }
  0x23   : > { %496 = vmatpush3.bf16.msra.mxu1 %v474_v22  ;;  %479 = vmatprep.subr.bf16.mxu0 %v478_v25 }
  0x24   : > { %489 = vmatprep.subr.bf16.mxu1 %v478_v25 }
  0x26   : > { %481 = vmatpush3.bf16.msra.mxu0 %v478_v25 }
  0x27   : > { %497 = vmatpush3.bf16.msra.mxu1 %v478_v25 }
  0x29   : > { %439 = vmatmul.mubr.f32.vlgmr.msra.gmra.mrb[0].mxu0 %v176_v26 }
  0x2a   : > { %445 = vmatmul.mubr.f32.vlgmr.msra.gmra.mrb[0].mxu1 %v180_v27  ;;  %441 = vmatprep.mubr.f32.mxu0 %v177_v28 }
  0x2b   : > { %447 = vmatprep.mubr.f32.mxu1 %v181_v29 }
  0x2d   : > { %442 = vmatmul.mubr.f32.gmra.mrb[2].mxu0 %v178_v30 }
  0x2e   : > { %448 = vmatmul.mubr.f32.gmra.mrb[2].mxu1 %v182_v31 }
  0xfc   : > { %v440_v33 = vpop.f32.mrb[0].mxu0 }
  0xfd   : > { %v446_v34 = vpop.f32.mrb[0].mxu1  ;;  %v273_v35 = vadd.f32 %v440_v33, %v200_v32  ;;  %v267_v37 = vpop.f32.mrb[1].mxu0 }
  0xfe   : > { %v293_v36 = vadd.f32 %v446_v34, %v200_v32  ;;  %v287_v38 = vpop.f32.mrb[1].mxu1  ;;  %v268_v39 = vadd.f32 %v267_v37, %v200_v32 }
  0xff   : > { %v288_v40 = vadd.f32 %v287_v38, %v200_v32  ;;  %308 = vst.msk [vmem:[%s173_s30 + $0x8] sm:$0xff] %vm306_vm0, %v273_v35 }
 0x100   : > { %312 = vst.msk [vmem:[%s173_s30 + $0x28] sm:$0xff] %vm306_vm0, %v293_v36  ;;  %307 = vst.msk [vmem:[%s173_s30] sm:$0xff] %vm306_vm0, %v268_v39  ;;  %v443_v41 = vpop.f32.mrb[2].mxu0 }
 0x101   : > { %311 = vst.msk [vmem:[%s173_s30 + $0x20] sm:$0xff] %vm306_vm0, %v288_v40  ;;  %v449_v42 = vpop.f32.mrb[2].mxu1  ;;  %v283_v43 = vadd.f32 %v443_v41, %v200_v32  ;;  %v277_v45 = vpop.f32.mrb[3].mxu0 }
 0x102   : > { %v303_v44 = vadd.f32 %v449_v42, %v200_v32  ;;  %v297_v46 = vpop.f32.mrb[3].mxu1  ;;  %v278_v47 = vadd.f32 %v277_v45, %v200_v32 }
 0x103   : > { %v298_v48 = vadd.f32 %v297_v46, %v200_v32  ;;  %310 = vst.msk [vmem:[%s173_s30 + $0x18] sm:$0xff] %vm306_vm0, %v283_v43 }
 0x104   : > { %314 = vst.msk [vmem:[%s173_s30 + $0x38] sm:$0xff] %vm306_vm0, %v303_v44  ;;  %309 = vst.msk [vmem:[%s173_s30 + $0x10] sm:$0xff] %vm306_vm0, %v278_v47 }
 0x105   : > { %313 = vst.msk [vmem:[%s173_s30 + $0x30] sm:$0xff] %vm306_vm0, %v298_v48 }
 0x106 PF: > { %s14_s14 = sadd.s32 1, %s512_s14  }
 0x107   : > { %p11_p4 = scmp.ge.s32.totalorder %s14_s14, 4  }
 0x109   :  { %13 = sbr.rel (!%p11_p4) target bundleno = 2 (0x2), region = 62 }

</bundles_post_ra>
